<compile_context>
chip_gen: v5e
topology: v5e:2x2
jax: 0.10.0
libtpu: 0.0.40
codegen_flags: <defaults>
</compile_context>

<pallas_src>
import functools

import jax
import jax.numpy as jnp
from jax.experimental import pallas as pl
from jax.experimental.pallas import tpu as pltpu

_LANES = 128


def _smooth_l1_kernel(pred_ref, target_ref, psum_ref, pmax_ref, *,
                      block_rows, steps_per_core, total_rows):
    c = pl.program_id(0)   # core split (parallel)
    i = pl.program_id(1)   # reduction steps within a core (arbitrary)

    @pl.when(i == 0)
    def _():
        psum_ref[...] = jnp.zeros_like(psum_ref)
        pmax_ref[...] = jnp.zeros_like(pmax_ref)   # smooth-L1 loss >= 0

    d = pred_ref[...].astype(jnp.float32) - target_ref[...].astype(jnp.float32)
    a = jnp.abs(d)
    # SmoothL1 (beta=1.0): 0.5*d^2 if |d| < 1 else |d| - 0.5
    loss = jnp.where(a < 1.0, 0.5 * d * d, a - 0.5)

    # Mask rows past the true extent (ragged last block and clamped overhang
    # iterations from the core split).  Safe for both sum and max since the
    # masked value 0 is the loss lower bound.
    rb = c * steps_per_core + i
    row_ids = rb * block_rows + jax.lax.broadcasted_iota(
        jnp.int32, (block_rows, _LANES), 0)
    loss = jnp.where(row_ids < total_rows, loss, 0.0)

    # Lane-parallel partial reduction: fold to one (8, 128) vreg tile on the
    # VPU and accumulate straight into the resident per-core output blocks.
    # The only cross-lane reduce happens once, in the wrapper.
    loss3 = loss.reshape(block_rows // 8, 8, _LANES)
    psum_ref[...] += jnp.sum(loss3, axis=0)
    pmax_ref[...] = jnp.maximum(pmax_ref[...], jnp.max(loss3, axis=0))


def custom_smooth_l1_loss(pred, target, *, block_rows=1024, num_cores=2):
    """Returns (mean_loss, max_elementwise_loss) matching CustomSmoothL1Loss.

    mean_loss == torch.mean(SmoothL1Loss(reduction='none')(pred, target))
    max_loss  == torch.max(...)   (the module's self.max_loss is then
                 max(previous_state, max_loss) -- kept host-side by callers)
    """
    assert pred.shape == target.shape
    n = pred.size
    if n == 0:
        z = jnp.float32(0.0)
        return z, z   # guard n == 0 (module would NaN; we define it as 0)

    flat_p = pred.reshape(-1)
    flat_t = target.reshape(-1)

    # Only pad (rarely) up to the next multiple of 128 so the 2-D view exists;
    # padded positions have pred == target == 0 -> loss 0, and are also below
    # the row mask only when a whole row is padding-free, so sum/max are exact.
    rem = n % _LANES
    if rem:
        pad = _LANES - rem
        flat_p = jnp.pad(flat_p, (0, pad))
        flat_t = jnp.pad(flat_t, (0, pad))

    rows = flat_p.shape[0] // _LANES
    P = flat_p.reshape(rows, _LANES)       # native dtype: bf16 stays bf16 on the DMA
    T = flat_t.reshape(rows, _LANES)

    # Tile rows: multiple of 8, no larger than the (rounded-up) row count.
    br = min(block_rows, ((rows + 7) // 8) * 8)
    br = max(8, (br // 8) * 8)
    num_blocks = pl.cdiv(rows, br)
    num_cores = max(1, min(num_cores, num_blocks))
    steps = pl.cdiv(num_blocks, num_cores)

    def in_map(c, i):
        # Clamp so overhang iterations re-read a valid block; their rows are
        # fully masked in-kernel so they contribute nothing.
        return (jnp.minimum(c * steps + i, num_blocks - 1), 0)

    kernel = functools.partial(
        _smooth_l1_kernel,
        block_rows=br, steps_per_core=steps, total_rows=rows)

    psum, pmax = pl.pallas_call(
        kernel,
        out_shape=(
            jax.ShapeDtypeStruct((num_cores * 8, _LANES), jnp.float32),
            jax.ShapeDtypeStruct((num_cores * 8, _LANES), jnp.float32),
        ),
        grid_spec=pltpu.PrefetchScalarGridSpec(
            num_scalar_prefetch=0,
            grid=(num_cores, steps),
            in_specs=[
                pl.BlockSpec((br, _LANES), in_map),
                pl.BlockSpec((br, _LANES), in_map),
            ],
            out_specs=[
                pl.BlockSpec((8, _LANES), lambda c, i: (c, 0)),
                pl.BlockSpec((8, _LANES), lambda c, i: (c, 0)),
            ],
        ),
        compiler_params=pltpu.CompilerParams(
            dimension_semantics=("parallel", "arbitrary")),
    )(P, T)

    mean_loss = jnp.sum(psum) / jnp.float32(n)
    max_loss = jnp.max(pmax)   # >= 0, matching the module's 0.0 floor on self.max_loss
    return mean_loss, max_loss


def _reference(pred, target):
    d = pred.astype(jnp.float32) - target.astype(jnp.float32)
    a = jnp.abs(d)
    loss = jnp.where(a < 1.0, 0.5 * d * d, a - 0.5)
    return jnp.mean(loss), jnp.max(loss)


if __name__ == "__main__":
    key = jax.random.PRNGKey(0)
    kp, kt, kp2, kt2 = jax.random.split(key, 4)

    # Small shapes consistent with a generic (N, C, H, W) regression target.
    pred = jax.random.normal(kp, (2, 4, 16, 16), dtype=jnp.float32) * 2.0
    target = jax.random.normal(kt, (2, 4, 16, 16), dtype=jnp.float32)

    mean_loss, max_loss = custom_smooth_l1_loss(pred, target)
    jax.block_until_ready((mean_loss, max_loss))

    ref_mean, ref_max = _reference(pred, target)
    assert jnp.allclose(mean_loss, ref_mean, rtol=1e-5, atol=1e-6), (mean_loss, ref_mean)
    assert jnp.allclose(max_loss, ref_max, rtol=1e-5, atol=1e-6), (max_loss, ref_max)

    # Ragged case (n not a multiple of 128) exercises the pad/mask path.
    pred2 = jax.random.normal(kp2, (3, 5, 7, 9), dtype=jnp.float32) * 3.0
    target2 = jax.random.normal(kt2, (3, 5, 7, 9), dtype=jnp.float32)
    m2, x2 = custom_smooth_l1_loss(pred2, target2)
    jax.block_until_ready((m2, x2))
    rm2, rx2 = _reference(pred2, target2)
    assert jnp.allclose(m2, rm2, rtol=1e-5, atol=1e-6), (m2, rm2)
    assert jnp.allclose(x2, rx2, rtol=1e-5, atol=1e-6), (x2, rx2)

    print("KERNEL_OK")
</pallas_src>

<mosaic_0001>
module attributes {stable_mosaic.version = 11 : i64} {
  func.func @_smooth_l1_kernel(%arg0: i32, %arg1: i32, %arg2: memref<16x128xf32, #tpu.memory_space<vmem>>, %arg3: memref<16x128xf32, #tpu.memory_space<vmem>>, %arg4: memref<8x128xf32, #tpu.memory_space<vmem>>, %arg5: memref<8x128xf32, #tpu.memory_space<vmem>>) attributes {dimension_semantics = [#tpu.dimension_semantics<parallel>, #tpu.dimension_semantics<arbitrary>], iteration_bounds = array<i64: 1, 1>, scalar_prefetch = 0 : i64, scratch_operands = 0 : i64, tpu.core_type = #tpu.core_type<tc>, window_params = [{transform_indices = @transform_0, window_bounds = array<i64: 16, 128>}, {transform_indices = @transform_1, window_bounds = array<i64: 16, 128>}, {transform_indices = @transform_2, window_bounds = array<i64: 8, 128>}, {transform_indices = @transform_3, window_bounds = array<i64: 8, 128>}]} {
    %c0_i32 = arith.constant 0 : i32
    %0 = arith.cmpi eq, %arg1, %c0_i32 : i32
    %1 = arith.extui %0 : i1 to i32
    %c0_i32_0 = arith.constant 0 : i32
    %2 = arith.cmpi ne, %1, %c0_i32_0 : i32
    scf.if %2 {
      %cst_18 = arith.constant 0.000000e+00 : f32
      %34 = vector.broadcast %cst_18 : f32 to vector<8x128xf32>
      %c0_19 = arith.constant 0 : index
      %c0_20 = arith.constant 0 : index
      %35 = vector.load %arg4[%c0_19, %c0_20] : memref<8x128xf32, #tpu.memory_space<vmem>>, vector<8x128xf32>
      tpu.vector_store %arg4[%c0_19, %c0_20], %34 {strides = array<i32>} : memref<8x128xf32, #tpu.memory_space<vmem>>, vector<8x128xf32>,
      %cst_21 = arith.constant 0.000000e+00 : f32
      %36 = vector.broadcast %cst_21 : f32 to vector<8x128xf32>
      %c0_22 = arith.constant 0 : index
      %c0_23 = arith.constant 0 : index
      %37 = vector.load %arg5[%c0_22, %c0_23] : memref<8x128xf32, #tpu.memory_space<vmem>>, vector<8x128xf32>
      tpu.vector_store %arg5[%c0_22, %c0_23], %36 {strides = array<i32>} : memref<8x128xf32, #tpu.memory_space<vmem>>, vector<8x128xf32>,
    } else {
    }
    %c0 = arith.constant 0 : index
    %c0_1 = arith.constant 0 : index
    %3 = vector.load %arg2[%c0, %c0_1] : memref<16x128xf32, #tpu.memory_space<vmem>>, vector<16x128xf32>
    %c0_2 = arith.constant 0 : index
    %c0_3 = arith.constant 0 : index
    %4 = vector.load %arg3[%c0_2, %c0_3] : memref<16x128xf32, #tpu.memory_space<vmem>>, vector<16x128xf32>
    %5 = arith.subf %3, %4 : vector<16x128xf32>
    %6 = math.absf %5 : vector<16x128xf32>
    %cst = arith.constant 1.000000e+00 : f32
    %7 = vector.broadcast %cst : f32 to vector<16x128xf32>
    %8 = arith.cmpf olt, %6, %7 : vector<16x128xf32>
    %cst_4 = arith.constant 5.000000e-01 : f32
    %9 = vector.broadcast %cst_4 : f32 to vector<16x128xf32>
    %10 = arith.mulf %9, %5 : vector<16x128xf32>
    %11 = arith.mulf %10, %5 : vector<16x128xf32>
    %cst_5 = arith.constant 5.000000e-01 : f32
    %12 = vector.broadcast %cst_5 : f32 to vector<16x128xf32>
    %13 = arith.subf %6, %12 : vector<16x128xf32>
    %14 = arith.select %8, %11, %13 : vector<16x128xi1>, vector<16x128xf32>
    %c1_i32 = arith.constant 1 : i32
    %15 = arith.muli %arg0, %c1_i32 : i32
    %16 = arith.addi %15, %arg1 : i32
    %c16_i32 = arith.constant 16 : i32
    %17 = arith.muli %16, %c16_i32 : i32
    %18 = tpu.iota {dimensions = array<i32: 0>} : vector<16x128xi32>
    %19 = vector.broadcast %17 : i32 to vector<16x128xi32>
    %20 = arith.addi %19, %18 : vector<16x128xi32>
    %c16_i32_6 = arith.constant 16 : i32
    %21 = vector.broadcast %c16_i32_6 : i32 to vector<16x128xi32>
    %22 = arith.cmpi slt, %20, %21 : vector<16x128xi32>
    %cst_7 = arith.constant 0.000000e+00 : f32
    %23 = vector.broadcast %cst_7 : f32 to vector<16x128xf32>
    %24 = arith.select %22, %14, %23 : vector<16x128xi1>, vector<16x128xf32>
    %25 = vector.shape_cast %24 : vector<16x128xf32> to vector<2x8x128xf32>
    %c0_8 = arith.constant 0 : index
    %c0_9 = arith.constant 0 : index
    %26 = vector.load %arg4[%c0_8, %c0_9] : memref<8x128xf32, #tpu.memory_space<vmem>>, vector<8x128xf32>
    %cst_10 = arith.constant dense<0.000000e+00> : vector<8x128xf32>
    %27 = vector.multi_reduction <add>, %25, %cst_10 [0] : vector<2x8x128xf32> to vector<8x128xf32>
    %28 = arith.addf %26, %27 : vector<8x128xf32>
    %c0_11 = arith.constant 0 : index
    %c0_12 = arith.constant 0 : index
    %29 = vector.load %arg4[%c0_11, %c0_12] : memref<8x128xf32, #tpu.memory_space<vmem>>, vector<8x128xf32>
    tpu.vector_store %arg4[%c0_11, %c0_12], %28 {strides = array<i32>} : memref<8x128xf32, #tpu.memory_space<vmem>>, vector<8x128xf32>,
    %c0_13 = arith.constant 0 : index
    %c0_14 = arith.constant 0 : index
    %30 = vector.load %arg5[%c0_13, %c0_14] : memref<8x128xf32, #tpu.memory_space<vmem>>, vector<8x128xf32>
    %cst_15 = arith.constant dense<0xFF800000> : vector<8x128xf32>
    %31 = vector.multi_reduction <maximumf>, %25, %cst_15 [0] : vector<2x8x128xf32> to vector<8x128xf32>
    %32 = arith.maximumf %30, %31 : vector<8x128xf32>
    %c0_16 = arith.constant 0 : index
    %c0_17 = arith.constant 0 : index
    %33 = vector.load %arg5[%c0_16, %c0_17] : memref<8x128xf32, #tpu.memory_space<vmem>>, vector<8x128xf32>
    tpu.vector_store %arg5[%c0_16, %c0_17], %32 {strides = array<i32>} : memref<8x128xf32, #tpu.memory_space<vmem>>, vector<8x128xf32>,
    return
  }
  func.func @transform_0(%arg0: i32, %arg1: i32) -> (i32, i32) {
    %c1_i32 = arith.constant 1 : i32
    %0 = arith.muli %arg0, %c1_i32 : i32
    %1 = arith.addi %0, %arg1 : i32
    %c0_i32 = arith.constant 0 : i32
    %2 = arith.minsi %1, %c0_i32 : i32
    %c0_i32_0 = arith.constant 0 : i32
    %c0_i32_1 = arith.constant 0 : i32
    return %2, %c0_i32_0 : i32, i32
  }
  func.func @transform_1(%arg0: i32, %arg1: i32) -> (i32, i32) {
    %c1_i32 = arith.constant 1 : i32
    %0 = arith.muli %arg0, %c1_i32 : i32
    %1 = arith.addi %0, %arg1 : i32
    %c0_i32 = arith.constant 0 : i32
    %2 = arith.minsi %1, %c0_i32 : i32
    %c0_i32_0 = arith.constant 0 : i32
    %c0_i32_1 = arith.constant 0 : i32
    return %2, %c0_i32_0 : i32, i32
  }
  func.func @transform_2(%arg0: i32, %arg1: i32) -> (i32, i32) {
    %c0_i32 = arith.constant 0 : i32
    %c0_i32_0 = arith.constant 0 : i32
    return %arg0, %c0_i32 : i32, i32
  }
  func.func @transform_3(%arg0: i32, %arg1: i32) -> (i32, i32) {
    %c0_i32 = arith.constant 0 : i32
    %c0_i32_0 = arith.constant 0 : i32
    return %arg0, %c0_i32 : i32, i32
  }
}

</mosaic_0001>

<bundles_post_ra>
// kernel: tpu_custom_call.1
= control target key start
LH: loop header
LB: loop body
LE: loop exit
PB: predicated region body
PF: predicated region fallthrough
CT: control target
= control target key end

     0   :  { %9 = vsyncpa [#allocation3], 0  ;;  %s300_s0 = inlined_call_operand.hbm [shape: f32[16,128], index: 0, kind: input, shape index: {}]   ;;  %s301_s1 = inlined_call_operand.hbm [shape: f32[16,128], index: 1, kind: input, shape index: {}]   ;;  %s302_s2 = inlined_call_operand.hbm [shape: f32[8,128], index: 2, kind: output, shape index: {0}]   ;;  %s303_s3 = inlined_call_operand.hbm [shape: f32[8,128], index: 3, kind: output, shape index: {1}]  }
   0x1   :  { %10 = vsyncpa [#allocation6], 0 }
   0x2   :  { %11 = vsyncpa [#allocation4], 0 }
   0x3   :  { %12 = vsyncpa [#allocation9], 0  ;;  %s23_s14 = sshll.u32 %s300_s0, 4  ;;  %s262_s15 = smov [#allocation2]   ;;  %s24_s14 = int_to_ptr.hbm [resolvable:$true] %s23_s14 }
   0x4   :  { %s25_s16 = sshll.u32 %s262_s15, 4  ;;  %s42_s19 = sshll.u32 %s301_s1, 4  ;;  %s26_s16 = int_to_ptr.vmem [resolvable:$true] %s25_s16  ;;  %s43_s19 = int_to_ptr.hbm [resolvable:$true] %s42_s19 }
   0x5   :  { %s263_s20 = smov 128   ;;  %s264_s21 = smov 8  }
   0x6   :  { %31 = dma.hbm_to_vmem [thread:$0]  %s24_s14, 256, %s26_s16, [#allocation3], %s263_s20, %s263_s20, %s264_s21  }
   0x7   :  { %s265_s22 = smov [#allocation5]  }
   0x8   :  { %s44_s23 = sshll.u32 %s265_s22, 4  ;;  %s45_s23 = int_to_ptr.vmem [resolvable:$true] %s44_s23 }
   0x9   :  { %50 = dma.hbm_to_vmem [thread:$0]  %s43_s19, 256, %s45_s23, [#allocation6], %s263_s20, %s263_s20, %s264_s21  }
   0xa   :  { %254 = dma.done.wait [#allocation3], 256  }
   0xb   :  { %255 = vsyncadd [#allocation3], 4294967040 }
   0xc   :  { %256 = dma.done.wait [#allocation6], 256  }
   0xd   :  { %257 = vsyncadd [#allocation6], 4294967040  ;;  %v73_v0 = vld [vmem:[#allocation2] sm:$0xff]  ;;  %v74_v1 = vld [vmem:[#allocation2 + $0x8] sm:$0xff]  ;;  %s266_s0 = smov [#allocation7]   ;;  %s118_s26 = sshll.u32 %s302_s2, 4  ;;  %s119_s26 = int_to_ptr.hbm [resolvable:$true] %s118_s26 }
   0xe   :  { %v75_v2 = vld [vmem:[#allocation5] sm:$0xff]  ;;  %v76_v3 = vld [vmem:[#allocation5 + $0x8] sm:$0xff]  ;;  %s116_s1 = sshll.u32 %s266_s0, 4  ;;  %s267_s27 = smov [#allocation8]   ;;  %s117_s1 = int_to_ptr.vmem [resolvable:$true] %s116_s1 }
   0xf   :  { %v77_v4 = vsub.f32 %v73_v0, %v75_v2  ;;  %v78_v5 = vsub.f32 %v74_v1, %v76_v3  ;;  %s127_s28 = sshll.u32 %s267_s27, 4  ;;  %s129_s4 = sshll.u32 %s303_s3, 4  ;;  %s128_s28 = int_to_ptr.vmem [resolvable:$true] %s127_s28  ;;  %s130_s4 = int_to_ptr.hbm [resolvable:$true] %s129_s4 }
  0x11   :  { %v79_v6 = vand.u32 2147483647, %v77_v4  ;;  %v83_v7 = vmul.f32 0.5, %v77_v4  ;;  %v80_v8 = vand.u32 2147483647, %v78_v5  ;;  %v84_v9 = vmul.f32 0.5, %v78_v5 }
  0x13   :  { %vm81_vm0 = vcmp.lt.f32.partialorder %v79_v6, 1.0  ;;  %v85_v10 = vmul.f32 %v83_v7, %v77_v4  ;;  %v149_v11 = vadd.f32 -0.5, %v79_v6  ;;  %vm82_vm1 = vcmp.lt.f32.partialorder %v80_v8, 1.0 }
  0x14   :  { %v86_v12 = vmul.f32 %v84_v9, %v78_v5  ;;  %v150_v13 = vadd.f32 -0.5, %v80_v8 }
  0x15   :  { %v89_v14 = vsel %vm81_vm0, %v85_v10, %v149_v11 }
  0x16   :  { %v90_v15 = vsel %vm82_vm1, %v86_v12, %v150_v13 }
  0x17   :  { %v104_v16 = vadd.f32 %v90_v15, %v89_v14  ;;  %v108_v17 = vmax.f32 %v89_v14, %v90_v15 }
  0x19   :  { %v109_v18 = vmax.f32 %v108_v17, 0.0  ;;  %106 = vst [vmem:[#allocation7] sm:$0xff] %v104_v16 }
  0x1a   :  { %121 = dma.vmem_to_hbm [thread:$0]  %s117_s1, 128, %s119_s26, [#allocation4]  }
  0x1b   :  { %110 = vst [vmem:[#allocation8] sm:$0xff] %v109_v18 }
  0x1c   :  { %132 = dma.vmem_to_hbm [thread:$0]  %s128_s28, 128, %s130_s4, [#allocation9]  }
  0x1d   :  { %258 = dma.done.wait [#allocation4], 128  }
  0x1e   :  { %259 = vsyncadd [#allocation4], 4294967168 }
  0x1f   :  { %260 = dma.done.wait [#allocation9], 128  }
  0x20   :  { %261 = vsyncadd [#allocation9], 4294967168 }
  0x21   :  { %141 = vsyncpa [#allocation3], 1 }
  0x22   :  { %142 = vsyncpa [#allocation6], 1 }
  0x23   :  { %143 = vsyncpa [#allocation4], 1 }
  0x24   :  { %144 = vsyncpa [#allocation9], 1 }

</bundles_post_ra>
